<compile_context>
chip_gen: v6e
topology: v6e:2x2x1
jax: 0.10.0
libtpu: 0.0.40
codegen_flags: <defaults>
</compile_context>

<pallas_src>
import jax
import jax.numpy as jnp
from jax.experimental import pallas as pl
from jax.experimental.pallas import tpu as pltpu


def _make_hbm_copy_kernel(rows, chunk_rows, n_chunks, n_inflight):
    """Kernel that copies `rows` leading-dim slices HBM->HBM in chunks."""

    def kernel(x_hbm, o_hbm, sem):
        def dma(c):
            start = c * chunk_rows
            size = min(chunk_rows, rows - start)  # static Python ints
            return pltpu.make_async_copy(
                x_hbm.at[pl.ds(start, size)],
                o_hbm.at[pl.ds(start, size)],
                sem.at[c % n_inflight],
            )

        # Prime up to `n_inflight` DMAs.
        for c in range(min(n_inflight, n_chunks)):
            dma(c).start()
        # Drain in order; refill the slot as soon as its copy completes.
        for c in range(n_chunks):
            dma(c).wait()
            nxt = c + n_inflight
            if nxt < n_chunks:
                dma(nxt).start()

    return kernel


def _skip_copy(states: jax.Array) -> jax.Array:
    """Materialize a fresh buffer equal to `states` via HBM->HBM DMA."""
    orig_shape = states.shape
    dtype = states.dtype
    total = states.size
    if total == 0:
        return states

    itemsize = jnp.dtype(dtype).itemsize

    # Lane-dense 2-D view when a multiple-of-128 column count divides the
    # element count; otherwise a flat 1-D view (DMAs do not need (8,128)
    # tiling since no VMEM is involved — slices are contiguous either way).
    cols = None
    c = 8192
    while c >= 128:
        if total % c == 0:
            cols = c
            break
        c -= 128
    if cols is not None:
        rows = total // cols
        view = states.reshape(rows, cols)
        row_bytes = cols * itemsize
    else:
        rows = total
        view = states.reshape(total)
        row_bytes = itemsize

    # Chunk the copy so a few DMAs are in flight (hides descriptor latency);
    # ~16 MiB per chunk, capped static unroll for very large arrays.
    target_chunk_bytes = 16 << 20
    chunk_rows = max(1, target_chunk_bytes // row_bytes)
    chunk_rows = min(chunk_rows, rows)
    n_chunks = -(-rows // chunk_rows)
    max_chunks = 64
    if n_chunks > max_chunks:
        chunk_rows = -(-rows // max_chunks)
        n_chunks = -(-rows // chunk_rows)
    n_inflight = min(4, n_chunks)

    out = pl.pallas_call(
        _make_hbm_copy_kernel(rows, chunk_rows, n_chunks, n_inflight),
        out_shape=jax.ShapeDtypeStruct(view.shape, dtype),
        in_specs=[pl.BlockSpec(memory_space=pl.ANY)],
        out_specs=pl.BlockSpec(memory_space=pl.ANY),
        scratch_shapes=[pltpu.SemaphoreType.DMA((n_inflight,))],
    )(view)
    return out.reshape(orig_shape)


def skip_forward(states: jax.Array, *, materialize: bool = False) -> jax.Array:
    """Forward pass of `Skip`.

    Default: true identity — returns `states` unchanged (no kernel, no HBM
    traffic), exactly matching the PyTorch module's semantics.
    materialize=True: returns a fresh buffer with identical contents via a
    Pallas HBM->HBM DMA copy kernel (no VMEM round-trip).
    """
    if not materialize:
        return states
    return _skip_copy(states)


if __name__ == "__main__":
    key = jax.random.PRNGKey(0)
    # Small NCHW-like input: batch=2, channels=4, 16x16 spatial.
    states = jax.random.normal(key, (2, 4, 16, 16), dtype=jnp.float32)

    # Fast path: identity with zero HBM traffic (matches nn.Module semantics).
    out_fast = jax.block_until_ready(skip_forward(states))

    # Materializing path: exercises the Pallas HBM->HBM DMA copy kernel.
    out_copy = jax.block_until_ready(skip_forward(states, materialize=True))

    assert out_fast.shape == states.shape and out_fast.dtype == states.dtype
    assert out_copy.shape == states.shape and out_copy.dtype == states.dtype
    assert bool(jnp.array_equal(out_fast, states))
    assert bool(jnp.array_equal(out_copy, states))

    print("KERNEL_OK")
</pallas_src>

<mosaic_0001>
module attributes {stable_mosaic.version = 11 : i64} {
  func.func @kernel(%arg0: memref<1x2048xf32, #tpu.memory_space<any>>, %arg1: memref<1x2048xf32, #tpu.memory_space<any>>, %arg2: memref<1x!tpu.dma_semaphore, #tpu.memory_space<semaphore_mem>>) attributes {dimension_semantics = [], scalar_prefetch = 0 : i64, scratch_operands = 1 : i64, tpu.core_type = #tpu.core_type<tc>} {
    %c0_i32 = arith.constant 0 : i32
    %c0_i32_0 = arith.constant 0 : i32
    %c0_i32_1 = arith.constant 0 : i32
    %0 = tpu.memref_slice %arg0[%c0_i32_0, %c0_i32_1] : memref<1x2048xf32, #tpu.memory_space<any>> -> memref<1x2048xf32, #tpu.memory_space<any>>
    %c0_i32_2 = arith.constant 0 : i32
    %c0_i32_3 = arith.constant 0 : i32
    %1 = tpu.memref_slice %arg1[%c0_i32_2, %c0_i32_3] : memref<1x2048xf32, #tpu.memory_space<any>> -> memref<1x2048xf32, #tpu.memory_space<any>>
    %2 = tpu.memref_slice %arg2[%c0_i32] : memref<1x!tpu.dma_semaphore, #tpu.memory_space<semaphore_mem>> -> memref<1x!tpu.dma_semaphore, #tpu.memory_space<semaphore_mem>>
    %3 = tpu.memref_squeeze %2 : memref<1x!tpu.dma_semaphore, #tpu.memory_space<semaphore_mem>> -> memref<!tpu.dma_semaphore, #tpu.memory_space<semaphore_mem>>
    tpu.enqueue_dma source(%0 : memref<1x2048xf32, #tpu.memory_space<any>>) target(%1 : memref<1x2048xf32, #tpu.memory_space<any>>) target_semaphore(%3 : memref<!tpu.dma_semaphore, #tpu.memory_space<semaphore_mem>>)
    %c0_i32_4 = arith.constant 0 : i32
    %c0_i32_5 = arith.constant 0 : i32
    %c0_i32_6 = arith.constant 0 : i32
    %4 = tpu.memref_slice %arg0[%c0_i32_5, %c0_i32_6] : memref<1x2048xf32, #tpu.memory_space<any>> -> memref<1x2048xf32, #tpu.memory_space<any>>
    %c0_i32_7 = arith.constant 0 : i32
    %c0_i32_8 = arith.constant 0 : i32
    %5 = tpu.memref_slice %arg1[%c0_i32_7, %c0_i32_8] : memref<1x2048xf32, #tpu.memory_space<any>> -> memref<1x2048xf32, #tpu.memory_space<any>>
    %6 = tpu.memref_slice %arg2[%c0_i32_4] : memref<1x!tpu.dma_semaphore, #tpu.memory_space<semaphore_mem>> -> memref<1x!tpu.dma_semaphore, #tpu.memory_space<semaphore_mem>>
    %7 = tpu.memref_squeeze %6 : memref<1x!tpu.dma_semaphore, #tpu.memory_space<semaphore_mem>> -> memref<!tpu.dma_semaphore, #tpu.memory_space<semaphore_mem>>
    tpu.wait_dma2 semaphore(%7 : memref<!tpu.dma_semaphore, #tpu.memory_space<semaphore_mem>>) src(%4 : memref<1x2048xf32, #tpu.memory_space<any>>) dst(%5 : memref<1x2048xf32, #tpu.memory_space<any>>)
    return
  }
}

</mosaic_0001>

<bundles_post_ra>
// kernel: tpu_custom_call.1
= control target key start
LH: loop header
LB: loop body
LE: loop exit
PB: predicated region body
PF: predicated region fallthrough
CT: control target
= control target key end

     0   :  { %s28_s6 = smov [#allocation2]   ;;  %s29_s7 = smov 131072   ;;  %s47_s0 = inlined_call_operand.hbm [shape: f32[1,2048], index: 0, kind: input, shape index: {}]   ;;  %s48_s1 = inlined_call_operand.hbm [shape: f32[1,2048], index: 1, kind: output, shape index: {}]  }
   0x1   :  { %s30_s8 = smov 0  }
   0x2   :  { %12 = dma.general %s47_s0, 256, %s48_s1, %s28_s6, %s29_s7, [#allocation4], %s30_s8, 0  }
   0x3   :  { %26 = dma.done.wait [#allocation2], 256 }
   0x4   :  { %27 = vsyncadd [#allocation2], 4294967040 }
   0x5   :  { %16 = vsyncmov [#allocation2] }
   0x8   :  { %s17_s13 = vpop.sfrf %16 }
   0x9   :  { %p22_p0 = scmp.ne.s32.totalorder %s17_s13, 0 }
   0xb   :  { %21 = shalt.err (%p22_p0)  }

</bundles_post_ra>
